<compile_context>
chip_gen: v5e
topology: v5e:2x2
jax: 0.10.0
libtpu: 0.0.40
codegen_flags: <defaults>
</compile_context>

<pallas_src>
import functools

import jax
import jax.numpy as jnp
from jax import lax
from jax.experimental import pallas as pl
from jax.experimental.pallas import tpu as pltpu

_LANES = 128
_SUBLANES = 8


def _static_pow(x, gamma):
    """x**gamma with trace-time specialization (x > 0 here)."""
    g = float(gamma)
    if g == 1.0:
        return x
    if g == int(g) and 1.0 < g <= 8.0:
        out = x
        for _ in range(int(g) - 1):
            out = out * x
        return out
    return jnp.power(x, g)  # general non-integer gamma: EUP exp+log fallback


def _l0_loss_kernel(p_ref, t_ref, out_ref, *, gamma, eps, tile_rows,
                    tiles_per_shard, n_valid_rows, n_rem_lanes, needs_mask):
    s = pl.program_id(0)   # shard axis ("parallel" -> megacore on v7x)
    i = pl.program_id(1)   # tile-within-shard axis ("arbitrary" reduction)

    @pl.when(i == 0)
    def _():
        out_ref[...] = jnp.zeros_like(out_ref)

    p = p_ref[...]
    t = t_ref[...]
    if p.dtype != jnp.float32:
        p = p.astype(jnp.float32)
    if t.dtype != jnp.float32:
        t = t.astype(jnp.float32)

    loss = _static_pow(jnp.abs(p - t) + eps, gamma)

    if needs_mask:
        # Exact tail handling: zero rows/lanes past the true element count.
        # Covers the <128-elem lane pad, a ragged last tile, and any
        # fully-out-of-range tiles assigned to the last shard.
        tile_idx = s * tiles_per_shard + i
        row_off = tile_idx * tile_rows
        rows = row_off + lax.broadcasted_iota(jnp.int32, (tile_rows, _LANES), 0)
        lanes = lax.broadcasted_iota(jnp.int32, (tile_rows, _LANES), 1)
        mask = (rows < n_valid_rows) | ((rows == n_valid_rows)
                                        & (lanes < n_rem_lanes))
        loss = jnp.where(mask, loss, 0.0)

    # vreg-shaped partial: (tile_rows,128) -> (tile_rows//8, 8, 128) -> (8,128)
    # Pure VPU adds; no per-tile cross-lane reduce, no scalar dependency chain.
    partial = loss.reshape(tile_rows // _SUBLANES, _SUBLANES, _LANES).sum(axis=0)
    out_ref[...] += partial[None, :, :]


def _round_up(x, k):
    return ((x + k - 1) // k) * k


def l0_loss(pred, target, gamma=2.0, eps=1e-8, *, tile_rows=1024, num_shards=2):
    assert pred.shape == target.shape, (pred.shape, target.shape)
    n_elem = int(pred.size)
    assert n_elem > 0

    flat_p = pred.reshape(-1)
    flat_t = target.reshape(-1)

    # Tiny pad (<128 elems) only if numel isn't lane-divisible; padded elements
    # are masked in-kernel so they contribute nothing.
    rem = n_elem % _LANES
    if rem:
        pad = _LANES - rem
        flat_p = jnp.pad(flat_p, (0, pad))
        flat_t = jnp.pad(flat_t, (0, pad))
    m = flat_p.shape[0] // _LANES
    p2d = flat_p.reshape(m, _LANES)
    t2d = flat_t.reshape(m, _LANES)

    # Block sizing: big lane-dense tiles, multiple of 8 sublanes, never much
    # larger than the array itself.
    tile_rows = int(min(_round_up(int(tile_rows), _SUBLANES),
                        _round_up(m, _SUBLANES)))
    n_tiles = -(-m // tile_rows)
    num_shards = int(max(1, min(int(num_shards), n_tiles)))
    tiles_per_shard = -(-n_tiles // num_shards)

    needs_mask = (rem != 0) or (m % tile_rows != 0) or \
                 (num_shards * tiles_per_shard != n_tiles)

    def in_map(s, i):
        t = s * tiles_per_shard + i
        # Clamp tiles past the end (possible for the last shard) onto a valid
        # block; their contribution is masked to zero inside the kernel.
        return (jnp.minimum(t, n_tiles - 1), 0)

    kernel = functools.partial(
        _l0_loss_kernel,
        gamma=float(gamma), eps=float(eps), tile_rows=tile_rows,
        tiles_per_shard=tiles_per_shard,
        n_valid_rows=n_elem // _LANES, n_rem_lanes=n_elem % _LANES,
        needs_mask=needs_mask)

    # Pipeline footprint: 2 inputs x 2 buffers x block.  Only ask for a larger
    # scoped-VMEM limit when the smallest default (16 MiB on v5e) could be hit;
    # default tiles (1024x128 f32 = 512 KiB) never need it.
    block_bytes = tile_rows * _LANES * pred.dtype.itemsize
    vmem_need = 4 * block_bytes + (1 << 20)
    params = dict(dimension_semantics=("parallel", "arbitrary"))
    if vmem_need > (12 << 20):
        params["vmem_limit_bytes"] = int(vmem_need + (4 << 20))

    partials = pl.pallas_call(
        kernel,
        out_shape=jax.ShapeDtypeStruct((num_shards, _SUBLANES, _LANES),
                                       jnp.float32),
        grid_spec=pltpu.PrefetchScalarGridSpec(
            num_scalar_prefetch=0,
            grid=(num_shards, tiles_per_shard),
            in_specs=[
                pl.BlockSpec((tile_rows, _LANES), in_map),
                pl.BlockSpec((tile_rows, _LANES), in_map),
            ],
            out_specs=pl.BlockSpec((1, _SUBLANES, _LANES),
                                   lambda s, i: (s, 0, 0)),
        ),
        compiler_params=pltpu.CompilerParams(**params),
    )(p2d, t2d)

    # Final tiny reduction (num_shards*8*128 values) + mean normalization.
    return jnp.sum(partials) / n_elem


def l0_loss_ref(pred, target, gamma=2.0, eps=1e-8):
    return jnp.mean((jnp.abs(pred - target) + eps) ** gamma)


if __name__ == "__main__":
    key = jax.random.PRNGKey(0)
    k1, k2 = jax.random.split(key)
    # NCHW like the PyTorch convention: batch=2, channels=4, H=W=16
    pred = jax.random.normal(k1, (2, 4, 16, 16), dtype=jnp.float32)
    target = jax.random.normal(k2, (2, 4, 16, 16), dtype=jnp.float32)

    out = l0_loss(pred, target, gamma=2.0, eps=1e-8)
    jax.block_until_ready(out)

    ref = l0_loss_ref(pred, target, gamma=2.0, eps=1e-8)
    assert jnp.allclose(out, ref, rtol=1e-5, atol=1e-6), (out, ref)
    print("KERNEL_OK")
</pallas_src>

<mosaic_0001>
module attributes {stable_mosaic.version = 11 : i64} {
  func.func @_l0_loss_kernel(%arg0: i32, %arg1: i32, %arg2: memref<16x128xf32, #tpu.memory_space<vmem>>, %arg3: memref<16x128xf32, #tpu.memory_space<vmem>>, %arg4: memref<1x8x128xf32, #tpu.memory_space<vmem>>) attributes {dimension_semantics = [#tpu.dimension_semantics<parallel>, #tpu.dimension_semantics<arbitrary>], iteration_bounds = array<i64: 1, 1>, scalar_prefetch = 0 : i64, scratch_operands = 0 : i64, tpu.core_type = #tpu.core_type<tc>, window_params = [{transform_indices = @transform_0, window_bounds = array<i64: 16, 128>}, {transform_indices = @transform_1, window_bounds = array<i64: 16, 128>}, {transform_indices = @transform_2, window_bounds = array<i64: 1, 8, 128>}]} {
    %c0_i32 = arith.constant 0 : i32
    %0 = arith.cmpi eq, %arg1, %c0_i32 : i32
    %1 = arith.extui %0 : i1 to i32
    %c0_i32_0 = arith.constant 0 : i32
    %2 = arith.cmpi ne, %1, %c0_i32_0 : i32
    scf.if %2 {
      %cst_11 = arith.constant 0.000000e+00 : f32
      %16 = vector.broadcast %cst_11 : f32 to vector<1x8x128xf32>
      %c0_12 = arith.constant 0 : index
      %c0_13 = arith.constant 0 : index
      %c0_14 = arith.constant 0 : index
      %17 = vector.load %arg4[%c0_12, %c0_13, %c0_14] : memref<1x8x128xf32, #tpu.memory_space<vmem>>, vector<1x8x128xf32>
      tpu.vector_store %arg4[%c0_12, %c0_13, %c0_14], %16 {strides = array<i32>} : memref<1x8x128xf32, #tpu.memory_space<vmem>>, vector<1x8x128xf32>,
    } else {
    }
    %c0 = arith.constant 0 : index
    %c0_1 = arith.constant 0 : index
    %3 = vector.load %arg2[%c0, %c0_1] : memref<16x128xf32, #tpu.memory_space<vmem>>, vector<16x128xf32>
    %c0_2 = arith.constant 0 : index
    %c0_3 = arith.constant 0 : index
    %4 = vector.load %arg3[%c0_2, %c0_3] : memref<16x128xf32, #tpu.memory_space<vmem>>, vector<16x128xf32>
    %5 = arith.subf %3, %4 : vector<16x128xf32>
    %6 = math.absf %5 : vector<16x128xf32>
    %cst = arith.constant 9.99999993E-9 : f32
    %7 = vector.broadcast %cst : f32 to vector<16x128xf32>
    %8 = arith.addf %6, %7 : vector<16x128xf32>
    %9 = arith.mulf %8, %8 : vector<16x128xf32>
    %10 = vector.shape_cast %9 : vector<16x128xf32> to vector<2x8x128xf32>
    %cst_4 = arith.constant dense<0.000000e+00> : vector<8x128xf32>
    %11 = vector.multi_reduction <add>, %10, %cst_4 [0] : vector<2x8x128xf32> to vector<8x128xf32>
    %c0_5 = arith.constant 0 : index
    %c0_6 = arith.constant 0 : index
    %c0_7 = arith.constant 0 : index
    %12 = vector.load %arg4[%c0_5, %c0_6, %c0_7] : memref<1x8x128xf32, #tpu.memory_space<vmem>>, vector<1x8x128xf32>
    %13 = vector.shape_cast %11 : vector<8x128xf32> to vector<1x8x128xf32>
    %14 = arith.addf %12, %13 : vector<1x8x128xf32>
    %c0_8 = arith.constant 0 : index
    %c0_9 = arith.constant 0 : index
    %c0_10 = arith.constant 0 : index
    %15 = vector.load %arg4[%c0_8, %c0_9, %c0_10] : memref<1x8x128xf32, #tpu.memory_space<vmem>>, vector<1x8x128xf32>
    tpu.vector_store %arg4[%c0_8, %c0_9, %c0_10], %14 {strides = array<i32>} : memref<1x8x128xf32, #tpu.memory_space<vmem>>, vector<1x8x128xf32>,
    return
  }
  func.func @transform_0(%arg0: i32, %arg1: i32) -> (i32, i32) {
    %c1_i32 = arith.constant 1 : i32
    %0 = arith.muli %arg0, %c1_i32 : i32
    %1 = arith.addi %0, %arg1 : i32
    %c0_i32 = arith.constant 0 : i32
    %2 = arith.minsi %1, %c0_i32 : i32
    %c0_i32_0 = arith.constant 0 : i32
    %c0_i32_1 = arith.constant 0 : i32
    return %2, %c0_i32_0 : i32, i32
  }
  func.func @transform_1(%arg0: i32, %arg1: i32) -> (i32, i32) {
    %c1_i32 = arith.constant 1 : i32
    %0 = arith.muli %arg0, %c1_i32 : i32
    %1 = arith.addi %0, %arg1 : i32
    %c0_i32 = arith.constant 0 : i32
    %2 = arith.minsi %1, %c0_i32 : i32
    %c0_i32_0 = arith.constant 0 : i32
    %c0_i32_1 = arith.constant 0 : i32
    return %2, %c0_i32_0 : i32, i32
  }
  func.func @transform_2(%arg0: i32, %arg1: i32) -> (i32, i32, i32) {
    %c0_i32 = arith.constant 0 : i32
    %c0_i32_0 = arith.constant 0 : i32
    %c0_i32_1 = arith.constant 0 : i32
    return %arg0, %c0_i32, %c0_i32_0 : i32, i32, i32
  }
}

</mosaic_0001>

<bundles_post_ra>
// kernel: tpu_custom_call.1
= control target key start
LH: loop header
LB: loop body
LE: loop exit
PB: predicated region body
PF: predicated region fallthrough
CT: control target
= control target key end

     0   :  { %7 = vsyncpa [#allocation3], 0  ;;  %s220_s0 = inlined_call_operand.hbm [shape: f32[16,128], index: 0, kind: input, shape index: {}]   ;;  %s221_s1 = inlined_call_operand.hbm [shape: f32[16,128], index: 1, kind: input, shape index: {}]   ;;  %s222_s2 = inlined_call_operand.hbm [shape: f32[1,8,128], index: 2, kind: output, shape index: {}]  }
   0x1   :  { %8 = vsyncpa [#allocation6], 0 }
   0x2   :  { %9 = vsyncpa [#allocation4], 0  ;;  %s20_s11 = sshll.u32 %s220_s0, 4  ;;  %s191_s12 = smov [#allocation2]   ;;  %s21_s11 = int_to_ptr.hbm [resolvable:$true] %s20_s11 }
   0x3   :  { %s22_s13 = sshll.u32 %s191_s12, 4  ;;  %s39_s16 = sshll.u32 %s221_s1, 4  ;;  %s23_s13 = int_to_ptr.vmem [resolvable:$true] %s22_s13  ;;  %s40_s16 = int_to_ptr.hbm [resolvable:$true] %s39_s16 }
   0x4   :  { %s192_s17 = smov 128   ;;  %s193_s18 = smov 8  }
   0x5   :  { %28 = dma.hbm_to_vmem [thread:$0]  %s21_s11, 256, %s23_s13, [#allocation3], %s192_s17, %s192_s17, %s193_s18  }
   0x6   :  { %s194_s19 = smov [#allocation5]  }
   0x7   :  { %s41_s20 = sshll.u32 %s194_s19, 4  ;;  %s42_s20 = int_to_ptr.vmem [resolvable:$true] %s41_s20 }
   0x8   :  { %47 = dma.hbm_to_vmem [thread:$0]  %s40_s16, 256, %s42_s20, [#allocation6], %s192_s17, %s192_s17, %s193_s18  }
   0x9   :  { %185 = dma.done.wait [#allocation3], 256  }
   0xa   :  { %186 = vsyncadd [#allocation3], 4294967040 }
   0xb   :  { %187 = dma.done.wait [#allocation6], 256  }
   0xc   :  { %188 = vsyncadd [#allocation6], 4294967040  ;;  %v69_v0 = vld [vmem:[#allocation2] sm:$0xff]  ;;  %v70_v1 = vld [vmem:[#allocation2 + $0x8] sm:$0xff]  ;;  %s195_s0 = smov [#allocation7]   ;;  %s92_s23 = sshll.u32 %s222_s2, 4  ;;  %s93_s23 = int_to_ptr.hbm [resolvable:$true] %s92_s23 }
   0xd   :  { %v71_v2 = vld [vmem:[#allocation5] sm:$0xff]  ;;  %v72_v3 = vld [vmem:[#allocation5 + $0x8] sm:$0xff]  ;;  %s90_s1 = sshll.u32 %s195_s0, 4  ;;  %s91_s1 = int_to_ptr.vmem [resolvable:$true] %s90_s1 }
   0xe   :  { %v73_v4 = vsub.f32 %v69_v0, %v71_v2  ;;  %v74_v5 = vsub.f32 %v70_v1, %v72_v3 }
  0x10   :  { %v75_v6 = vand.u32 2147483647, %v73_v4  ;;  %v76_v7 = vand.u32 2147483647, %v74_v5 }
  0x12   :  { %v77_v8 = vadd.f32 1e-08, %v75_v6  ;;  %v78_v9 = vadd.f32 1e-08, %v76_v7 }
  0x14   :  { %v79_v10 = vmul.f32 %v77_v8, %v77_v8  ;;  %v80_v11 = vmul.f32 %v78_v9, %v78_v9 }
  0x16   :  { %v81_v12 = vadd.f32 %v80_v11, %v79_v10 }
  0x18   :  { %84 = vst [vmem:[#allocation7] sm:$0xff] %v81_v12 }
  0x19   :  { %95 = dma.vmem_to_hbm [thread:$0]  %s91_s1, 128, %s93_s23, [#allocation4]  }
  0x1a   :  { %189 = dma.done.wait [#allocation4], 128  }
  0x1b   :  { %190 = vsyncadd [#allocation4], 4294967168 }
  0x1c   :  { %100 = vsyncpa [#allocation3], 1 }
  0x1d   :  { %101 = vsyncpa [#allocation6], 1 }
  0x1e   :  { %102 = vsyncpa [#allocation4], 1 }

</bundles_post_ra>
